<compile_context>
chip_gen: v5e
topology: v5e:2x2
jax: 0.10.0
libtpu: 0.0.40
codegen_flags: <defaults>
</compile_context>

<pallas_src>
import jax
import jax.numpy as jnp
from jax.experimental import pallas as pl
from jax.experimental.pallas import tpu as pltpu


# Conservative per-call VMEM budget before switching to a batch grid.
# v7x: 64 MiB physical / 32 MiB default scoped VMEM per TC (v5e/v6e: 128 MiB).
_WHOLE_ARRAY_VMEM_BUDGET = 16 * 1024 * 1024


def _add_embed_kernel(emb_ref, stream_ref, o_ref):
    # emb_ref:    (Np, F)        per-token embedding rows (pad row included)
    # stream_ref: (B|1, Np, F)   position-encoded prompt tokens (zero row for the pad token)
    # o_ref:      (B|1, Np, F)
    # Pure VPU broadcast-add, single unmasked full-tile store; no cross-lane work, no MXU.
    o_ref[...] = (stream_ref[...] + emb_ref[...][None, :, :]).astype(o_ref.dtype)


def init_prompt_encoder_params(key, output_channels=256, dtype=jnp.float32):
    ks = jax.random.split(key, 5)
    mk = lambda k: (jax.random.normal(k, (1, output_channels), dtype) * 0.02)
    return {
        "tl_embed": mk(ks[0]),
        "br_embed": mk(ks[1]),
        "fg_embed": mk(ks[2]),
        "bg_embed": mk(ks[3]),
        "not_a_point_embed": mk(ks[4]),
    }


def build_prompt_token_embeddings(params, num_boxes, num_fg_pts, num_bg_pts,
                                  dtype=jnp.float32):
    """Precompute the per-token embedding slab (Np, F) for a static prompt layout.

    Hoist this out of the per-call path (call once per (Nb, Nf, Nbg) layout and
    reuse) — the tile/concat of parameter rows otherwise costs as much as the
    kernel launch itself.

    Row order matches the module output: [tl, br]*Nb, fg*Nf, bg*Nbg, not_a_point*P.
    Returns (emb_slab, num_padding_points).
    """
    no_points = (num_fg_pts == 0) and (num_bg_pts == 0)
    no_boxes = (num_boxes == 0)
    num_pad = 0 if (no_boxes and no_points) else 1

    rows = []
    if num_boxes > 0:
        tlbr = jnp.concatenate([params["tl_embed"], params["br_embed"]], axis=0)  # (2, F)
        rows.append(jnp.tile(tlbr, (num_boxes, 1)))                               # tl,br,tl,br,...
    if num_fg_pts > 0:
        rows.append(jnp.tile(params["fg_embed"], (num_fg_pts, 1)))
    if num_bg_pts > 0:
        rows.append(jnp.tile(params["bg_embed"], (num_bg_pts, 1)))
    if num_pad > 0:
        rows.append(jnp.tile(params["not_a_point_embed"], (num_pad, 1)))

    if not rows:
        feat = params["tl_embed"].shape[-1]
        return jnp.zeros((0, feat), dtype), 0
    return jnp.concatenate(rows, axis=0).astype(dtype), num_pad


def sam_v2_prompt_encoder(posenc_boxes, posenc_fg_pts, posenc_bg_pts, params,
                          token_embeds=None):
    """posenc_boxes: (B, Nb, 2, F); posenc_fg_pts: (B, Nf, F); posenc_bg_pts: (B, Nbg, F).

    token_embeds: optional precomputed (emb_slab, num_pad) from
    build_prompt_token_embeddings(); pass it to keep per-call glue minimal.
    """
    B = posenc_fg_pts.shape[0]
    Nb = posenc_boxes.shape[1]
    Nf = posenc_fg_pts.shape[1]
    Nbg = posenc_bg_pts.shape[1]
    F = params["tl_embed"].shape[-1]
    # Output dtype is the promotion of all three prompt inputs (not just fg).
    out_dtype = jnp.result_type(posenc_boxes.dtype, posenc_fg_pts.dtype,
                                posenc_bg_pts.dtype)

    if token_embeds is None:
        emb_slab, num_pad = build_prompt_token_embeddings(params, Nb, Nf, Nbg, out_dtype)
    else:
        emb_slab, num_pad = token_embeds
        emb_slab = emb_slab.astype(out_dtype)

    Np = 2 * Nb + Nf + Nbg + num_pad
    if Np == 0:
        return jnp.zeros((B, 0, F), out_dtype)

    # One prompt-token stream (B, Np, F): single input DMA; the pad token row is a
    # zero row so adding the slab yields the not_a_point embedding directly.
    # NOTE: on bf16 inputs the add runs in bf16 (native on v6e/v7x); differs from an
    # f32-promoted reference by ~1 ulp.
    parts = []
    if Nb > 0:
        parts.append(posenc_boxes.reshape(B, 2 * Nb, F).astype(out_dtype))
    if Nf > 0:
        parts.append(posenc_fg_pts.astype(out_dtype))
    if Nbg > 0:
        parts.append(posenc_bg_pts.astype(out_dtype))
    if num_pad > 0:
        parts.append(jnp.zeros((B, num_pad, F), out_dtype))
    stream = parts[0] if len(parts) == 1 else jnp.concatenate(parts, axis=1)

    # Keep the feature (lane) axis dense: pad to a multiple of 128, slice after.
    Fp = F
    if F % 128 != 0:
        Fp = max(128, ((F + 127) // 128) * 128)
        stream = jnp.pad(stream, ((0, 0), (0, 0), (0, Fp - F)))
        emb_slab = jnp.pad(emb_slab, ((0, 0), (0, Fp - F)))

    itemsize = jnp.dtype(out_dtype).itemsize
    working_set = (2 * B * Np * Fp + Np * Fp) * itemsize  # stream + output + slab

    if working_set <= _WHOLE_ARRAY_VMEM_BUDGET:
        # Microkernel path: whole working set is a few KB, so any grid would be
        # pure ~0.35 us/step overhead (and would re-fetch the shared slab).
        vmem_spec = pl.BlockSpec(memory_space=pltpu.MemorySpace.VMEM)
        out = pl.pallas_call(
            _add_embed_kernel,
            out_shape=jax.ShapeDtypeStruct((B, Np, Fp), out_dtype),
            in_specs=[vmem_spec, vmem_spec],
            out_specs=vmem_spec,
        )(emb_slab, stream)
    else:
        # Large-batch path: tile over batch to respect v7x's 32 MiB scoped VMEM and
        # shard across its 2 TensorCores via "parallel" semantics.
        out = pl.pallas_call(
            _add_embed_kernel,
            out_shape=jax.ShapeDtypeStruct((B, Np, Fp), out_dtype),
            grid_spec=pltpu.PrefetchScalarGridSpec(
                num_scalar_prefetch=0,
                grid=(B,),
                in_specs=[pl.BlockSpec((Np, Fp), lambda b: (0, 0)),
                          pl.BlockSpec((1, Np, Fp), lambda b: (b, 0, 0))],
                out_specs=pl.BlockSpec((1, Np, Fp), lambda b: (b, 0, 0)),
            ),
            compiler_params=pltpu.CompilerParams(
                dimension_semantics=("parallel",)),
        )(emb_slab, stream)

    return out[:, :, :F] if Fp != F else out


def _reference(posenc_boxes, posenc_fg_pts, posenc_bg_pts, params):
    B, Nb = posenc_boxes.shape[0], posenc_boxes.shape[1]
    F = params["tl_embed"].shape[-1]
    boxes = posenc_boxes.at[:, :, 0, :].add(params["tl_embed"][0])
    boxes = boxes.at[:, :, 1, :].add(params["br_embed"][0])
    boxes_as_pts = boxes.reshape(B, 2 * Nb, F)
    fg = posenc_fg_pts + params["fg_embed"]
    bg = posenc_bg_pts + params["bg_embed"]
    no_points = posenc_fg_pts.shape[1] == 0 and posenc_bg_pts.shape[1] == 0
    no_boxes = posenc_boxes.shape[1] == 0
    num_pad = 0 if (no_boxes and no_points) else 1
    pad = jnp.tile(params["not_a_point_embed"][None], (B, num_pad, 1))
    return jnp.concatenate([boxes_as_pts, fg, bg, pad], axis=1).astype(posenc_fg_pts.dtype)


if __name__ == "__main__":
    key = jax.random.PRNGKey(0)
    k_par, k_box, k_fg, k_bg = jax.random.split(key, 4)

    F = 256          # output_channels (module default)
    B, Nb, Nf, Nbg = 2, 2, 3, 1

    params = init_prompt_encoder_params(k_par, output_channels=F)
    posenc_boxes = jax.random.normal(k_box, (B, Nb, 2, F), jnp.float32)
    posenc_fg_pts = jax.random.normal(k_fg, (B, Nf, F), jnp.float32)
    posenc_bg_pts = jax.random.normal(k_bg, (B, Nbg, F), jnp.float32)

    # Hoist the per-token embedding slab out of the per-call path (perf review #1).
    token_embeds = build_prompt_token_embeddings(params, Nb, Nf, Nbg, jnp.float32)
    token_embeds = (jax.block_until_ready(token_embeds[0]), token_embeds[1])

    out = sam_v2_prompt_encoder(posenc_boxes, posenc_fg_pts, posenc_bg_pts, params,
                                token_embeds=token_embeds)
    out = jax.block_until_ready(out)

    ref = _reference(posenc_boxes, posenc_fg_pts, posenc_bg_pts, params)
    assert out.shape == (B, 2 * Nb + Nf + Nbg + 1, F), out.shape
    assert jnp.allclose(out, ref, atol=1e-5, rtol=1e-5), "mismatch vs reference"

    print("KERNEL_OK")
</pallas_src>

<mosaic_0001>
module attributes {stable_mosaic.version = 11 : i64} {
  func.func @_add_embed_kernel(%arg0: memref<9x256xf32, #tpu.memory_space<vmem>>, %arg1: memref<2x9x256xf32, #tpu.memory_space<vmem>>, %arg2: memref<2x9x256xf32, #tpu.memory_space<vmem>>) attributes {dimension_semantics = [], scalar_prefetch = 0 : i64, scratch_operands = 0 : i64, tpu.core_type = #tpu.core_type<tc>} {
    %c0 = arith.constant 0 : index
    %c0_0 = arith.constant 0 : index
    %c0_1 = arith.constant 0 : index
    %0 = vector.load %arg1[%c0, %c0_0, %c0_1] : memref<2x9x256xf32, #tpu.memory_space<vmem>>, vector<2x9x256xf32>
    %c0_2 = arith.constant 0 : index
    %c0_3 = arith.constant 0 : index
    %1 = vector.load %arg0[%c0_2, %c0_3] : memref<9x256xf32, #tpu.memory_space<vmem>>, vector<9x256xf32>
    %2 = vector.shape_cast %1 : vector<9x256xf32> to vector<1x9x256xf32>
    %3 = vector.broadcast %2 : vector<1x9x256xf32> to vector<2x9x256xf32>
    %4 = arith.addf %0, %3 : vector<2x9x256xf32>
    %c0_4 = arith.constant 0 : index
    %c0_5 = arith.constant 0 : index
    %c0_6 = arith.constant 0 : index
    %5 = vector.load %arg2[%c0_4, %c0_5, %c0_6] : memref<2x9x256xf32, #tpu.memory_space<vmem>>, vector<2x9x256xf32>
    tpu.vector_store %arg2[%c0_4, %c0_5, %c0_6], %4 {strides = array<i32>} : memref<2x9x256xf32, #tpu.memory_space<vmem>>, vector<2x9x256xf32>,
    return
  }
}

</mosaic_0001>

<bundles_post_ra>
// kernel: tpu_custom_call.1
= control target key start
LH: loop header
LB: loop body
LE: loop exit
PB: predicated region body
PF: predicated region fallthrough
CT: control target
= control target key end

     0   :  { %s118_s0 = inlined_call_operand.vmem [shape: f32[9,256], index: 0, kind: input, shape index: {}]   ;;  %s119_s1 = inlined_call_operand.vmem [shape: f32[2,9,256], index: 1, kind: input, shape index: {}]   ;;  %s120_s2 = inlined_call_operand.vmem [shape: f32[2,9,256], index: 2, kind: output, shape index: {}]  }
   0x1   :  { %v11_v0 = vld [vmem:[%s119_s1] sm:$0xff]  ;;  %v12_v2 = vld [vmem:[%s119_s1 + $0x8] sm:$0xff]  ;;  %v13_v5 = vld [vmem:[%s119_s1 + $0x10] sm:$0x1] }
   0x2   :  { %v19_v1 = vld [vmem:[%s118_s0] sm:$0xff]  ;;  %v20_v4 = vld [vmem:[%s118_s0 + $0x8] sm:$0xff]  ;;  %v21_v6 = vld [vmem:[%s118_s0 + $0x10] sm:$0x1] }
   0x3   :  { %v23_v3 = vadd.f32 %v19_v1, %v11_v0  ;;  %v24_v7 = vadd.f32 %v20_v4, %v12_v2  ;;  %v25_v8 = vadd.f32 %v21_v6, %v13_v5  ;;  %v14_v9 = vld [vmem:[%s119_s1 + $0x18] sm:$0x1]  ;;  %v15_v11 = vld [vmem:[%s119_s1 + $0x20] sm:$0xff]  ;;  %v16_v14 = vld [vmem:[%s119_s1 + $0x28] sm:$0xff] }
   0x4   :  { %v22_v10 = vld [vmem:[%s118_s0 + $0x18] sm:$0x1]  ;;  %v27_v13 = vadd.f32 %v19_v1, %v15_v11  ;;  %v17_v15 = vld [vmem:[%s119_s1 + $0x30] sm:$0x1]  ;;  %v28_v17 = vadd.f32 %v20_v4, %v16_v14 }
   0x5   :  { %31 = vst [vmem:[%s120_s2] sm:$0xff] %v23_v3  ;;  %v26_v12 = vadd.f32 %v22_v10, %v14_v9  ;;  %v18_v16 = vld [vmem:[%s119_s1 + $0x38] sm:$0x1]  ;;  %v29_v18 = vadd.f32 %v21_v6, %v17_v15 }
   0x6   :  { %32 = vst [vmem:[%s120_s2 + $0x8] sm:$0xff] %v24_v7  ;;  %v30_v19 = vadd.f32 %v22_v10, %v18_v16 }
   0x7   :  { %33 = vst [vmem:[%s120_s2 + $0x10] sm:$0x1] %v25_v8 }
   0x8   :  { %34 = vst [vmem:[%s120_s2 + $0x18] sm:$0x1] %v26_v12 }
   0x9   :  { %35 = vst [vmem:[%s120_s2 + $0x20] sm:$0xff] %v27_v13 }
   0xa   :  { %36 = vst [vmem:[%s120_s2 + $0x28] sm:$0xff] %v28_v17 }
   0xb   :  { %37 = vst [vmem:[%s120_s2 + $0x30] sm:$0x1] %v29_v18 }
   0xc   :  { %38 = vst [vmem:[%s120_s2 + $0x38] sm:$0x1] %v30_v19 }

</bundles_post_ra>
